<compile_context>
chip_gen: v5e
topology: v5e:2x2
jax: 0.10.0
libtpu: 0.0.40
codegen_flags: <defaults>
</compile_context>

<pallas_src>
import functools

import jax
import jax.numpy as jnp
import numpy as np
from jax.experimental import pallas as pl
from jax.experimental.pallas import tpu as pltpu


def _round_up(v, m):
    return (v + m - 1) // m * m


def _patch_embed_gemm_kernel(x_ref, w_ref, b_ref, o_ref):
    # x_ref: (tm, Kp) compute dtype; w_ref: (Kp, Ep) compute dtype (resident);
    # b_ref: (1, Ep) f32 (resident); o_ref: (tm, Ep) compute dtype.
    acc = jnp.dot(x_ref[...], w_ref[...], preferred_element_type=jnp.float32)
    o_ref[...] = (acc + b_ref[...]).astype(o_ref.dtype)


def _vmem_cap_bytes():
    # 85% of physical VMEM: headroom for Mosaic internal scratch / semaphores
    # on v7x (64 MiB), full use of the 128 MiB on v5e/v6e.
    try:
        return int(0.85 * pltpu.get_tpu_info().vmem_capacity_bytes)
    except Exception:  # pragma: no cover - conservative fallback
        return 48 * 1024 * 1024


def _x_in_spec(tm_eff, Kp, num_tiles):
    # 3-deep input pipelining only when there are enough grid steps for it to
    # hide residual input-DMA latency; plain double-buffering otherwise.
    if num_tiles >= 3:
        try:
            return pl.BlockSpec((tm_eff, Kp), lambda i: (i, 0),
                                pipeline_mode=pl.Buffered(3))
        except TypeError:  # pragma: no cover - older BlockSpec signature
            pass
    return pl.BlockSpec((tm_eff, Kp), lambda i: (i, 0))


@functools.partial(jax.jit, static_argnames=("patch_size", "tm", "compute_dtype"))
def unstructured_patch_embed(x, weight, bias, *, patch_size, tm=512,
                             compute_dtype=jnp.bfloat16):
    """x: (B, N, C, H, W); weight: (E, C, P, P); bias: (E,).

    Returns (B, N*H'*W', E) in `compute_dtype`.  bf16 operands/output with f32
    MXU accumulation by default; pass compute_dtype=jnp.float32 for exact
    PyTorch Conv2d-style f32 semantics.
    """
    B, N, C, H, W = x.shape
    P = patch_size
    Hp, Wp = H // P, W // P
    E = weight.shape[0]
    K = C * P * P
    M = B * N * Hp * Wp

    in_bytes = jnp.dtype(compute_dtype).itemsize
    out_bytes = in_bytes

    # Conv2d with stride == kernel drops any spatial remainder.
    if H != Hp * P or W != Wp * P:
        x = x[:, :, :, : Hp * P, : Wp * P]

    # Lane-aligned (multiple-of-128) contraction / output-feature dims.
    # (Production K=768 / E=768..1280 are already aligned -> no-op pads.)
    Kp = _round_up(K, 128)
    Ep = _round_up(E, 128)

    # Row tile: adapt to small problems, shrink if the VMEM footprint of
    # (x tiles + resident weight + bias + out tiles) would exceed the cap.
    vmem_cap = _vmem_cap_bytes()

    def footprint(t):
        return (3 * t * Kp * in_bytes          # x tile, up to triple-buffered
                + 2 * Kp * Ep * in_bytes       # resident weight (x2, conservative)
                + 2 * Ep * 4                   # bias
                + 2 * t * Ep * out_bytes)      # output tile, double-buffered

    tm_eff = _round_up(min(tm, _round_up(M, 16)), 16)
    while footprint(tm_eff) + (8 << 20) > vmem_cap and tm_eff > 16:
        tm_eff = _round_up(max(16, tm_eff // 2), 16)

    Mp = _round_up(M, tm_eff)
    num_tiles = Mp // tm_eff

    # Patch extraction as one (M, K) matrix, K in (c, ph, pw) order matching
    # the flattened OIHW conv weight.  Cast to the compute dtype FIRST so the
    # materialized transpose intermediate is half-sized; allow_input_fusion
    # (below) lets XLA fold the transpose/pad into the kernel's input DMA when
    # it can.
    # TODO(synk): fully fused path that reads x in native (C, H, W) layout per
    # row-block and does the (c, ph, pw) rearrangement in-kernel.
    xp = (
        x.astype(compute_dtype)
        .reshape(B, N, C, Hp, P, Wp, P)
        .transpose(0, 1, 3, 5, 2, 4, 6)          # (B, N, Hp, Wp, C, P, P)
        .reshape(M, K)
    )
    if Mp != M or Kp != K:
        xp = jnp.pad(xp, ((0, Mp - M), (0, Kp - K)))

    wmat = weight.reshape(E, K).T.astype(compute_dtype)          # (K, E)
    if Kp != K or Ep != E:
        wmat = jnp.pad(wmat, ((0, Kp - K), (0, Ep - E)))
    b2 = bias.astype(jnp.float32)
    if Ep != E:
        b2 = jnp.pad(b2, (0, Ep - E))
    b2 = b2.reshape(1, Ep)

    vmem_limit = min(vmem_cap, footprint(tm_eff) + (8 << 20))

    cost = pl.CostEstimate(
        flops=2 * Mp * Kp * Ep,
        transcendentals=0,
        bytes_accessed=(Mp * Kp * in_bytes + Kp * Ep * in_bytes
                        + Mp * Ep * out_bytes + Ep * 4),
    )

    out = pl.pallas_call(
        _patch_embed_gemm_kernel,
        out_shape=jax.ShapeDtypeStruct((Mp, Ep), compute_dtype),
        grid=(num_tiles,),
        in_specs=[
            _x_in_spec(tm_eff, Kp, num_tiles),
            pl.BlockSpec((Kp, Ep), lambda i: (0, 0)),   # resident weight
            pl.BlockSpec((1, Ep), lambda i: (0, 0)),    # resident bias
        ],
        out_specs=pl.BlockSpec((tm_eff, Ep), lambda i: (i, 0)),
        compiler_params=pltpu.CompilerParams(
            dimension_semantics=("parallel",),
            vmem_limit_bytes=int(vmem_limit),
            allow_input_fusion=[True, True, True],
        ),
        cost_estimate=cost,
    )(xp, wmat, b2)

    if Mp != M or Ep != E:
        out = out[:M, :E]
    return out.reshape(B, N * Hp * Wp, E)


def _reference(x, weight, bias, patch_size):
    """Pure-JAX f32 reference using a strided conv (mirrors PyTorch Conv2d, NCHW)."""
    B, N, C, H, W = x.shape
    P = patch_size
    E = weight.shape[0]
    Hp, Wp = H // P, W // P
    xf = x.reshape(B * N, C, H, W)
    y = jax.lax.conv_general_dilated(
        xf, weight, window_strides=(P, P), padding="VALID",
        dimension_numbers=("NCHW", "OIHW", "NCHW"),
    ) + bias.reshape(1, E, 1, 1)
    y = y.reshape(B, N, E, Hp, Wp).transpose(0, 1, 3, 4, 2).reshape(B, N * Hp * Wp, E)
    return y


if __name__ == "__main__":
    # Small shapes consistent with the module's forward.
    B, N, C, H, W = 2, 3, 4, 16, 16
    P = 8           # patch_size
    E = 32          # embed_dim

    key = jax.random.PRNGKey(0)
    kx, kw, kb = jax.random.split(key, 3)
    x = jax.random.normal(kx, (B, N, C, H, W), dtype=jnp.float32)
    # Conv2d-shaped parameters: weight (E, C, P, P), bias (E,)
    weight = jax.random.normal(kw, (E, C, P, P), dtype=jnp.float32) * 0.02
    bias = jax.random.normal(kb, (E,), dtype=jnp.float32) * 0.02

    out = jax.block_until_ready(unstructured_patch_embed(x, weight, bias, patch_size=P))
    assert out.shape == (B, N * (H // P) * (W // P), E), out.shape

    ref = jax.block_until_ready(_reference(x, weight, bias, P))
    # bf16 operands + bf16 output with f32 MXU accumulation vs pure-f32 conv ref.
    np.testing.assert_allclose(np.asarray(out.astype(jnp.float32)), np.asarray(ref),
                               rtol=3e-2, atol=3e-2)

    print("KERNEL_OK")
</pallas_src>

<mosaic_0001>
module attributes {stable_mosaic.version = 11 : i64} {
  func.func @_patch_embed_gemm_kernel(%arg0: i32, %arg1: memref<32x256xbf16, #tpu.memory_space<vmem>>, %arg2: memref<256x128xbf16, #tpu.memory_space<vmem>>, %arg3: memref<1x128xf32, #tpu.memory_space<vmem>>, %arg4: memref<32x128xbf16, #tpu.memory_space<vmem>>) attributes {dimension_semantics = [#tpu.dimension_semantics<parallel>], iteration_bounds = array<i64: 1>, scalar_prefetch = 0 : i64, scratch_operands = 0 : i64, tpu.core_type = #tpu.core_type<tc>, window_params = [{transform_indices = @transform_0, window_bounds = array<i64: 32, 256>}, {pipeline_mode = #tpu.pipeline_mode<synchronous>, transform_indices = @transform_1, window_bounds = array<i64: 256, 128>}, {pipeline_mode = #tpu.pipeline_mode<synchronous>, transform_indices = @transform_2, window_bounds = array<i64: 1, 128>}, {transform_indices = @transform_3, window_bounds = array<i64: 32, 128>}]} {
    %c0 = arith.constant 0 : index
    %c0_0 = arith.constant 0 : index
    %0 = vector.load %arg1[%c0, %c0_0] : memref<32x256xbf16, #tpu.memory_space<vmem>>, vector<32x256xbf16>
    %c0_1 = arith.constant 0 : index
    %c0_2 = arith.constant 0 : index
    %1 = vector.load %arg2[%c0_1, %c0_2] : memref<256x128xbf16, #tpu.memory_space<vmem>>, vector<256x128xbf16>
    %cst = arith.constant dense<0.000000e+00> : vector<32x128xf32>
    %2 = tpu.matmul %0, %1, %cst {dimension_numbers = #tpu.dot_dimension_numbers<[1], [0], [0], [1], [0, 0, 1, 1], [], []>} : vector<32x256xbf16>, vector<256x128xbf16>, vector<32x128xf32> -> vector<32x128xf32>
    %c0_3 = arith.constant 0 : index
    %c0_4 = arith.constant 0 : index
    %3 = vector.load %arg3[%c0_3, %c0_4] : memref<1x128xf32, #tpu.memory_space<vmem>>, vector<1x128xf32>
    %4 = vector.broadcast %3 : vector<1x128xf32> to vector<32x128xf32>
    %5 = arith.addf %2, %4 : vector<32x128xf32>
    %6 = arith.truncf %5 : vector<32x128xf32> to vector<32x128xbf16>
    %c0_5 = arith.constant 0 : index
    %c0_6 = arith.constant 0 : index
    %7 = vector.load %arg4[%c0_5, %c0_6] : memref<32x128xbf16, #tpu.memory_space<vmem>>, vector<32x128xbf16>
    tpu.vector_store %arg4[%c0_5, %c0_6], %6 {strides = array<i32>} : memref<32x128xbf16, #tpu.memory_space<vmem>>, vector<32x128xbf16>,
    return
  }
  func.func @transform_0(%arg0: i32) -> (i32, i32) {
    %c0_i32 = arith.constant 0 : i32
    %c0_i32_0 = arith.constant 0 : i32
    return %arg0, %c0_i32 : i32, i32
  }
  func.func @transform_1(%arg0: i32) -> (i32, i32) {
    %c0_i32 = arith.constant 0 : i32
    %c0_i32_0 = arith.constant 0 : i32
    %c0_i32_1 = arith.constant 0 : i32
    return %c0_i32, %c0_i32_0 : i32, i32
  }
  func.func @transform_2(%arg0: i32) -> (i32, i32) {
    %c0_i32 = arith.constant 0 : i32
    %c0_i32_0 = arith.constant 0 : i32
    %c0_i32_1 = arith.constant 0 : i32
    return %c0_i32, %c0_i32_0 : i32, i32
  }
  func.func @transform_3(%arg0: i32) -> (i32, i32) {
    %c0_i32 = arith.constant 0 : i32
    %c0_i32_0 = arith.constant 0 : i32
    return %arg0, %c0_i32 : i32, i32
  }
}

</mosaic_0001>

<bundles_post_ra>
// kernel: unstructured_patch_embed.2
= control target key start
LH: loop header
LB: loop body
LE: loop exit
PB: predicated region body
PF: predicated region fallthrough
CT: control target
= control target key end

     0   :  { %s1455_s0 = inlined_call_operand.vmem [shape: bf16[256,32], index: 0, kind: input, shape index: {}]   ;;  %s1456_s1 = inlined_call_operand.<no memory space> [shape: bf16[], index: 1, kind: input, shape index: {}]   ;;  %s1457_s2 = inlined_call_operand.vmem [shape: bf16[24,256], index: 2, kind: input, shape index: {}]   ;;  %s1458_s3 = inlined_call_operand.vmem [shape: f32[32], index: 3, kind: input, shape index: {}]   ;;  %s1459_s4 = inlined_call_operand.<no memory space> [shape: f32[], index: 4, kind: input, shape index: {}]   ;;  %s1460_s5 = inlined_call_operand.vmem [shape: bf16[32,128], index: 5, kind: output, shape index: {}]  }
   0x1   :  { %v10_v0 = vstv %s1456_s1  ;;  %v20_v1 = vstv %s1459_s4 }
   0x2   :  { %v1280_v2 = vunpack.i.l.bf16 %v10_v0 }
   0x3   :  { %v119_v3 = vlaneseq  ;;  %v1073_v4 = vld [vmem:[%s1455_s0 + $0x38] sm:$0xff]   ;;  %v1071_v6 = vld [vmem:[%s1455_s0 + $0x30] sm:$0xff]   ;;  %v1069_v12 = vld [vmem:[%s1455_s0 + $0x28] sm:$0xff]  }
   0x4   :  { %v1089_v5 = vld [vmem:[%s1455_s0 + $0x78] sm:$0xff]   ;;  %v438_v7 = vunpack.c.l.bf16 %v1073_v4  ;;  %v461_v8 = vunpack.c.h.bf16 %v1073_v4  ;;  %v1087_v11 = vld [vmem:[%s1455_s0 + $0x70] sm:$0xff]   ;;  %v392_v14 = vunpack.c.l.bf16 %v1071_v6  ;;  %v415_v15 = vunpack.c.h.bf16 %v1071_v6  ;;  %v1085_v17 = vld [vmem:[%s1455_s0 + $0x68] sm:$0xff]  }
   0x5   :  { %v806_v9 = vunpack.c.l.bf16 %v1089_v5  ;;  %v829_v10 = vunpack.c.h.bf16 %v1089_v5  ;;  %v1298_v13 = vand.u32 127, %v119_v3  ;;  %v760_v16 = vunpack.c.l.bf16 %v1087_v11  ;;  %v1067_v29 = vld [vmem:[%s1455_s0 + $0x20] sm:$0xff]   ;;  %v1065_v44 = vld [vmem:[%s1455_s0 + $0x18] sm:$0xff]   ;;  %v1063_v58 = vld [vmem:[%s1455_s0 + $0x10] sm:$0xff]  }
   0x6   :  { %v783_v18 = vunpack.c.h.bf16 %v1087_v11  ;;  %v346_v19 = vunpack.c.l.bf16 %v1069_v12  ;;  %v369_v20 = vunpack.c.h.bf16 %v1069_v12  ;;  %v714_v28 = vunpack.c.l.bf16 %v1085_v17  ;;  %v1083_v37 = vld [vmem:[%s1455_s0 + $0x60] sm:$0xff]   ;;  %v1081_v51 = vld [vmem:[%s1455_s0 + $0x58] sm:$0xff]   ;;  %v1079_v5 = vld [vmem:[%s1455_s0 + $0x50] sm:$0xff]  }
   0x7   :  { %vm122_vm0 = vcmp.lt.s32.totalorder %v1298_v13, 32  ;;  %v737_v36 = vunpack.c.h.bf16 %v1085_v17  ;;  %v300_v40 = vunpack.c.l.bf16 %v1067_v29  ;;  %v323_v43 = vunpack.c.h.bf16 %v1067_v29  ;;  %v1225_v13 = vld [vmem:[%s1457_s2 + $0x8] sm:$0xff] }
   0x8   :  { %v444_v21 = vsel %vm122_vm0, %v438_v7, %v1280_v2  ;;  %v467_v22 = vsel %vm122_vm0, %v461_v8, %v1280_v2  ;;  %v812_v23 = vsel %vm122_vm0, %v806_v9, %v1280_v2  ;;  %v835_v24 = vsel %vm122_vm0, %v829_v10, %v1280_v2  ;;  %1195 = vst [vmem:[#allocation17 + $0x8] sm:$0xff] %v1225_v13  }
   0x9   :  { %v446_v25 = vpack.c.bf16 0.0, %v444_v21  ;;  %v469_v26 = vpack.c.bf16 0.0, %v467_v22  ;;  %v814_v27 = vpack.c.bf16 0.0, %v812_v23  ;;  %v837_v30 = vpack.c.bf16 0.0, %v835_v24  ;;  %v1077_v22 = vld [vmem:[%s1455_s0 + $0x48] sm:$0xff]  }
   0xa   :  { %v398_v31 = vsel %vm122_vm0, %v392_v14, %v1280_v2  ;;  %v421_v32 = vsel %vm122_vm0, %v415_v15, %v1280_v2  ;;  %v766_v33 = vsel %vm122_vm0, %v760_v16, %v1280_v2  ;;  %v789_v35 = vsel %vm122_vm0, %v783_v18, %v1280_v2  ;;  %v1061_v14 = vld [vmem:[%s1455_s0 + $0x8] sm:$0xff]  }
   0xb   :  { %449 = vst [vmem:[#allocation18 + $0x38] sm:$0xf] %v446_v25  ;;  %v400_v34 = vpack.c.bf16 0.0, %v398_v31  ;;  %v423_v38 = vpack.c.bf16 0.0, %v421_v32  ;;  %v352_v39 = vsel %vm122_vm0, %v346_v19, %v1280_v2  ;;  %v768_v41 = vpack.c.bf16 0.0, %v766_v33 }
   0xc   :  { %472 = vst [vmem:[#allocation18 + $0x3c] sm:$0xf] %v469_v26  ;;  %v375_v42 = vsel %vm122_vm0, %v369_v20, %v1280_v2  ;;  %v791_v45 = vpack.c.bf16 0.0, %v789_v35  ;;  %v720_v46 = vsel %vm122_vm0, %v714_v28, %v1280_v2  ;;  %v668_v47 = vunpack.c.l.bf16 %v1083_v37 }
   0xd   :  { %817 = vst [vmem:[#allocation18 + $0x78] sm:$0xf] %v814_v27  ;;  %v354_v48 = vpack.c.bf16 0.0, %v352_v39  ;;  %v743_v49 = vsel %vm122_vm0, %v737_v36, %v1280_v2  ;;  %v691_v50 = vunpack.c.h.bf16 %v1083_v37  ;;  %v377_v52 = vpack.c.bf16 0.0, %v375_v42 }
   0xe   :  { %840 = vst [vmem:[#allocation18 + $0x7c] sm:$0xf] %v837_v30  ;;  %v306_v53 = vsel %vm122_vm0, %v300_v40, %v1280_v2  ;;  %v254_v54 = vunpack.c.l.bf16 %v1065_v44  ;;  %v722_v55 = vpack.c.bf16 0.0, %v720_v46  ;;  %v329_v56 = vsel %vm122_vm0, %v323_v43, %v1280_v2  ;;  %v116_v30 = vld [vmem:[%s1455_s0] sm:$0xff]  }
   0xf   :  { %403 = vst [vmem:[#allocation18 + $0x30] sm:$0xf] %v400_v34  ;;  %v277_v57 = vunpack.c.h.bf16 %v1065_v44  ;;  %v745_v59 = vpack.c.bf16 0.0, %v743_v49  ;;  %v674_v60 = vsel %vm122_vm0, %v668_v47, %v1280_v2  ;;  %v622_v61 = vunpack.c.l.bf16 %v1081_v51 }
  0x10   :  { %426 = vst [vmem:[#allocation18 + $0x34] sm:$0xf] %v423_v38  ;;  %v308_v63 = vpack.c.bf16 0.0, %v306_v53  ;;  %v697_v0 = vsel %vm122_vm0, %v691_v50, %v1280_v2  ;;  %v645_v4 = vunpack.c.h.bf16 %v1081_v51  ;;  %v331_v6 = vpack.c.bf16 0.0, %v329_v56  ;;  %v1075_v38 = vld [vmem:[%s1455_s0 + $0x40] sm:$0xff]  }
  0x11   :  { %771 = vst [vmem:[#allocation18 + $0x70] sm:$0xf] %v768_v41  ;;  %v260_v7 = vsel %vm122_vm0, %v254_v54, %v1280_v2  ;;  %v208_v8 = vunpack.c.l.bf16 %v1063_v58  ;;  %v676_v10 = vpack.c.bf16 0.0, %v674_v60  ;;  %v283_v11 = vsel %vm122_vm0, %v277_v57, %v1280_v2 }
  0x12   :  { %794 = vst [vmem:[#allocation18 + $0x74] sm:$0xf] %v791_v45  ;;  %v231_v12 = vunpack.c.h.bf16 %v1063_v58  ;;  %v699_v15 = vpack.c.bf16 0.0, %v697_v0  ;;  %v628_v16 = vsel %vm122_vm0, %v622_v61, %v1280_v2  ;;  %v576_v17 = vunpack.c.l.bf16 %v1079_v5 }
  0x13   :  { %v1182_v62 = vld [vmem:[#allocation18 + $0x38] sm:$0xff]  ;;  %357 = vst [vmem:[#allocation18 + $0x28] sm:$0xf] %v354_v48  ;;  %v262_v19 = vpack.c.bf16 0.0, %v260_v7  ;;  %v651_v20 = vsel %vm122_vm0, %v645_v4, %v1280_v2  ;;  %v599_v21 = vunpack.c.h.bf16 %v1079_v5  ;;  %v285_v23 = vpack.c.bf16 0.0, %v283_v11  ;;  %v27_v7 = vld [vmem:[%s1457_s2] sm:$0xff]  }
  0x14   :  { %380 = vst [vmem:[#allocation18 + $0x2c] sm:$0xf] %v377_v52  ;;  %1005 = vmatpush.bf16.msra.mxu0 %v1182_v62  ;;  %1227 = vmatpush.bf16.msra.mxu2 %v1182_v62  ;;  %v214_v24 = vsel %vm122_vm0, %v208_v8, %v1280_v2  ;;  %v162_v25 = vunpack.c.l.bf16 %v1061_v14  ;;  %v630_v27 = vpack.c.bf16 0.0, %v628_v16  ;;  %v237_v28 = vsel %vm122_vm0, %v231_v12, %v1280_v2  ;;  %v1226_v8 = vld [vmem:[%s1457_s2 + $0x10] sm:$0xff] }
  0x15   :  { %v1190_v9 = vld [vmem:[#allocation18 + $0x78] sm:$0xff]  ;;  %725 = vst [vmem:[#allocation18 + $0x68] sm:$0xf] %v722_v55  ;;  %v185_v29 = vunpack.c.h.bf16 %v1061_v14  ;;  %v653_v31 = vpack.c.bf16 0.0, %v651_v20  ;;  %v582_v32 = vsel %vm122_vm0, %v576_v17, %v1280_v2  ;;  %v530_v33 = vunpack.c.l.bf16 %v1077_v22 }
  0x16   :  { %748 = vst [vmem:[#allocation18 + $0x6c] sm:$0xf] %v745_v59  ;;  %1024 = vmatpush.bf16.msra.mxu1 %v1190_v9  ;;  %1235 = vmatpush.bf16.msra.mxu3 %v1190_v9  ;;  %v216_v35 = vpack.c.bf16 0.0, %v214_v24  ;;  %v605_v36 = vsel %vm122_vm0, %v599_v21, %v1280_v2  ;;  %v553_v37 = vunpack.c.h.bf16 %v1077_v22  ;;  %v239_v39 = vpack.c.bf16 0.0, %v237_v28 }
  0x17   :  { %v1181_v18 = vld [vmem:[#allocation18 + $0x30] sm:$0xff]  ;;  %311 = vst [vmem:[#allocation18 + $0x20] sm:$0xf] %v308_v63  ;;  %v168_v40 = vsel %vm122_vm0, %v162_v25, %v1280_v2  ;;  %v117_v41 = vunpack.c.l.bf16 %v116_v30  ;;  %v584_v43 = vpack.c.bf16 0.0, %v582_v32  ;;  %v191_v44 = vsel %vm122_vm0, %v185_v29, %v1280_v2 }
  0x18   :  { %334 = vst [vmem:[#allocation18 + $0x24] sm:$0xf] %v331_v6  ;;  %1006 = vmatpush.bf16.msra.mxu0 %v1181_v18  ;;  %1228 = vmatpush.bf16.msra.mxu2 %v1181_v18  ;;  %v139_v45 = vunpack.c.h.bf16 %v116_v30  ;;  %v607_v46 = vpack.c.bf16 0.0, %v605_v36  ;;  %v536_v47 = vsel %vm122_vm0, %v530_v33, %v1280_v2  ;;  %v484_v48 = vunpack.c.l.bf16 %v1075_v38  ;;  %v1172_v18 = vld [vmem:[#allocation17 + $0x4] sm:$0xf0] }
  0x19   :  { %v1189_v26 = vld [vmem:[#allocation18 + $0x70] sm:$0xff]  ;;  %679 = vst [vmem:[#allocation18 + $0x60] sm:$0xf] %v676_v10  ;;  %v170_v50 = vpack.c.bf16 0.0, %v168_v40  ;;  %v559_v51 = vsel %vm122_vm0, %v553_v37, %v1280_v2  ;;  %v507_v52 = vunpack.c.h.bf16 %v1075_v38  ;;  %v193_v53 = vpack.c.bf16 0.0, %v191_v44 }
  0x1a   :  { %702 = vst [vmem:[#allocation18 + $0x64] sm:$0xf] %v699_v15  ;;  %1025 = vmatpush.bf16.msra.mxu1 %v1189_v26  ;;  %1236 = vmatpush.bf16.msra.mxu3 %v1189_v26  ;;  %v123_v54 = vsel %vm122_vm0, %v117_v41, %v1280_v2  ;;  %v538_v56 = vpack.c.bf16 0.0, %v536_v47  ;;  %v145_v57 = vsel %vm122_vm0, %v139_v45, %v1280_v2  ;;  %v561_v58 = vpack.c.bf16 0.0, %v559_v51  ;;  %v841_v10 = vld [vmem:[%s1458_s3] sm:$0x1] }
  0x1b   :  { %v1180_v34 = vld [vmem:[#allocation18 + $0x28] sm:$0xff]  ;;  %265 = vst [vmem:[#allocation18 + $0x18] sm:$0xf] %v262_v19  ;;  %v490_v59 = vsel %vm122_vm0, %v484_v48, %v1280_v2  ;;  %v124_v61 = vpack.c.bf16 0.0, %v123_v54  ;;  %v513_v62 = vsel %vm122_vm0, %v507_v52, %v1280_v2  ;;  %v147_v63 = vpack.c.bf16 0.0, %v145_v57 }
  0x1c   :  { %288 = vst [vmem:[#allocation18 + $0x1c] sm:$0xf] %v285_v23  ;;  %1007 = vmatpush.bf16.msra.mxu0 %v1180_v34  ;;  %1229 = vmatpush.bf16.msra.mxu2 %v1180_v34  ;;  %v492_v4 = vpack.c.bf16 0.0, %v490_v59  ;;  %v515_v5 = vpack.c.bf16 0.0, %v513_v62  ;;  %vm844_vm1 = vcmp.lt.s32.totalorder %v119_v3, 32  ;;  %v1204_v11 = vpack.c.bf16 %v1280_v2, %v1280_v2 }
  0x1d   :  { %v1188_v42 = vld [vmem:[#allocation18 + $0x68] sm:$0xff]  ;;  %633 = vst [vmem:[#allocation18 + $0x58] sm:$0xf] %v630_v27  ;;  %v845_v14 = vsel %vm844_vm1, %v841_v10, %v20_v1 }
  0x1e   :  { %656 = vst [vmem:[#allocation18 + $0x5c] sm:$0xf] %v653_v31  ;;  %1026 = vmatpush.bf16.msra.mxu1 %v1188_v42  ;;  %1237 = vmatpush.bf16.msra.mxu3 %v1188_v42  ;;  %v1095_v19 = vld [vmem:[#allocation17 + $0x8] sm:$0xf0] }
  0x1f   :  { %v1179_v49 = vld [vmem:[#allocation18 + $0x20] sm:$0xff]  ;;  %219 = vst [vmem:[#allocation18 + $0x10] sm:$0xf] %v216_v35 }
  0x20   :  { %242 = vst [vmem:[#allocation18 + $0x14] sm:$0xf] %v239_v39  ;;  %1008 = vmatpush.bf16.msra.mxu0 %v1179_v49  ;;  %1230 = vmatpush.bf16.msra.mxu2 %v1179_v49 }
  0x21   :  { %v1187_v55 = vld [vmem:[#allocation18 + $0x60] sm:$0xff]  ;;  %587 = vst [vmem:[#allocation18 + $0x50] sm:$0xf] %v584_v43 }
  0x22   :  { %610 = vst [vmem:[#allocation18 + $0x54] sm:$0xf] %v607_v46  ;;  %1027 = vmatpush.bf16.msra.mxu1 %v1187_v55  ;;  %1238 = vmatpush.bf16.msra.mxu3 %v1187_v55 }
  0x23   :  { %v1178_v60 = vld [vmem:[#allocation18 + $0x18] sm:$0xff]  ;;  %173 = vst [vmem:[#allocation18 + $0x8] sm:$0xf] %v170_v50 }
  0x24   :  { %196 = vst [vmem:[#allocation18 + $0xc] sm:$0xf] %v193_v53  ;;  %1009 = vmatpush.bf16.msra.mxu0 %v1178_v60  ;;  %1231 = vmatpush.bf16.msra.mxu2 %v1178_v60 }
  0x25   :  { %v1186_v0 = vld [vmem:[#allocation18 + $0x58] sm:$0xff]  ;;  %541 = vst [vmem:[#allocation18 + $0x48] sm:$0xf] %v538_v56 }
  0x26   :  { %564 = vst [vmem:[#allocation18 + $0x4c] sm:$0xf] %v561_v58  ;;  %1028 = vmatpush.bf16.msra.mxu1 %v1186_v0  ;;  %1239 = vmatpush.bf16.msra.mxu3 %v1186_v0 }
  0x27   :  { %v1177_v6 = vld [vmem:[#allocation18 + $0x10] sm:$0xff]  ;;  %127 = vst [vmem:[#allocation18] sm:$0xf] %v124_v61 }
  0x28   :  { %150 = vst [vmem:[#allocation18 + $0x4] sm:$0xf] %v147_v63  ;;  %1010 = vmatpush.bf16.msra.mxu0 %v1177_v6  ;;  %1232 = vmatpush.bf16.msra.mxu2 %v1177_v6 }
  0x29   :  { %v1185_v9 = vld [vmem:[#allocation18 + $0x50] sm:$0xff]  ;;  %495 = vst [vmem:[#allocation18 + $0x40] sm:$0xf] %v492_v4 }
  0x2a   :  { %518 = vst [vmem:[#allocation18 + $0x44] sm:$0xf] %v515_v5  ;;  %1029 = vmatpush.bf16.msra.mxu1 %v1185_v9  ;;  %1240 = vmatpush.bf16.msra.mxu3 %v1185_v9 }
  0x2b   :  { %v1176_v12 = vld [vmem:[#allocation18 + $0x8] sm:$0xff]  ;;  %33 = vst [vmem:[#allocation17] sm:$0xff] %v27_v7  }
  0x2c   :  { %1011 = vmatpush.bf16.msra.mxu0 %v1176_v12  ;;  %1233 = vmatpush.bf16.msra.mxu2 %v1176_v12  ;;  %1200 = vst [vmem:[#allocation17 + $0x10] sm:$0xff] %v1226_v8  }
  0x2d   :  { %v1184_v15 = vld [vmem:[#allocation18 + $0x48] sm:$0xff]  ;;  %1205 = vst [vmem:[#allocation17 + $0x18] sm:$0xff] %v1204_v11  }
  0x2e   :  { %1030 = vmatpush.bf16.msra.mxu1 %v1184_v15  ;;  %1241 = vmatpush.bf16.msra.mxu3 %v1184_v15  ;;  %848 = vst [vmem:[#allocation19] sm:$0x1] %v845_v14 }
  0x2f   :  { %v1175_v3 = vld [vmem:[#allocation18] sm:$0xff] }
  0x30   :  { %1012 = vmatpush.bf16.msra.mxu0 %v1175_v3  ;;  %1234 = vmatpush.bf16.msra.mxu2 %v1175_v3 }
  0x31   :  { %v1183_v2 = vld [vmem:[#allocation18 + $0x40] sm:$0xff] }
  0x32   :  { %v1093_v16 = vld [vmem:[#allocation17] sm:$0xf]  ;;  %v1171_v17 = vld [vmem:[#allocation17 + $0x4] sm:$0xf]  ;;  %1031 = vmatpush.bf16.msra.mxu1 %v1183_v2  ;;  %1242 = vmatpush.bf16.msra.mxu3 %v1183_v2 }
  0x33   :  { %v1094_v20 = vor.u32 %v1172_v18, %v1093_v16  ;;  %v1101_v1 = vld [vmem:[#allocation17 + $0x10] sm:$0xf]  ;;  %v1098_v21 = vor.u32 %v1171_v17, %v1095_v19  ;;  %v1173_v22 = vld [vmem:[#allocation17 + $0x14] sm:$0xf] }
  0x34   :  { %v1174_v23 = vld [vmem:[#allocation17 + $0x14] sm:$0xf0]  ;;  %v1103_v24 = vld [vmem:[#allocation17 + $0x18] sm:$0xf0] }
  0x35   :  { %1013 = vmatmul.bf16.vlgmr.msra.gmra.mxu0 %v1094_v20  ;;  %v1102_v25 = vor.u32 %v1174_v23, %v1101_v1  ;;  %1032 = vmatmul.bf16.vlgmr.msra.gmra.mxu1 %v1098_v21  ;;  %v1106_v26 = vor.u32 %v1173_v22, %v1103_v24  ;;  %v1243_v29 = vld [vmem:[#allocation19] ss:$0 sm:$0xff] }
  0x37   :  { %1018 = vmatmul.bf16.vlgmr.msra.gmra.mxu2 %v1102_v25  ;;  %1037 = vmatmul.bf16.vlgmr.msra.gmra.mxu3 %v1106_v26 }
  0xb2   :  { %v1014_v27 = vpop.f32.mrf.mxu0  ;;  %v1033_v28 = vpop.f32.mrf.mxu1 }
  0xb3   :  { %v1015_v30 = vadd.f32 %v1243_v29, %v1014_v27 }
  0xb5   :  { %v1034_v36 = vadd.f32 %v1033_v28, %v1015_v30 }
  0xba   :  { %v1019_v31 = vpop.f32.mrf.mxu2  ;;  %v1038_v32 = vpop.f32.mrf.mxu3 }
  0xbb   :  { %v1016_v33 = vpop.f32.mrf.mxu0  ;;  %v1035_v35 = vpop.f32.mrf.mxu1  ;;  %v1020_v39 = vadd.f32 %v1243_v29, %v1019_v31 }
  0xbc   :  { %v1017_v34 = vadd.f32 %v1243_v29, %v1016_v33 }
  0xbd   :  { %v1039_v43 = vadd.f32 %v1038_v32, %v1020_v39 }
  0xbe   :  { %v1036_v37 = vadd.f32 %v1035_v35, %v1017_v34 }
  0xc0   :  { %v1209_v38 = vpack.c.bf16 %v1036_v37, %v1034_v36 }
  0xc2   :  { %1210 = vst [vmem:[%s1460_s5] sm:$0xff] %v1209_v38   ;;  %v1021_v40 = vpop.f32.mrf.mxu2  ;;  %v1040_v42 = vpop.f32.mrf.mxu3 }
  0xc3   :  { %v1022_v41 = vadd.f32 %v1243_v29, %v1021_v40 }
  0xc5   :  { %v1041_v44 = vadd.f32 %v1040_v42, %v1022_v41 }
  0xc7   :  { %v1214_v45 = vpack.c.bf16 %v1041_v44, %v1039_v43 }
  0xc9   :  { %1224 = vst [vmem:[%s1460_s5 + $0x8] sm:$0xff] %v1214_v45  }

</bundles_post_ra>
